<compile_context>
chip_gen: v7x
topology: tpu7x:2x2x1
jax: 0.10.0
libtpu: 0.0.40
codegen_flags: <defaults>
</compile_context>

<pallas_src>
import functools

import jax
import jax.numpy as jnp
from jax.experimental import pallas as pl
from jax.experimental.pallas import tpu as pltpu

# Pendulum-v1 dimensions (hard-coded; no gym dependency):
STATE_DIM = 3        # env.observation_space.shape[0]
ACTION_DIM = 1       # env.action_space.shape[0]
HIDDEN_DIM = 64
ACTION_BOUND = 2.0   # env.action_space.high[0]

# Padded, vreg-friendly sizes.
S_PAD = 8            # state dim padded to a sublane multiple; column STATE_DIM carries the 1s
H_PAD = 128          # hidden dim padded to full lane width; row HIDDEN_DIM is the bias unit
LANES = 128
MAX_B_TILE = 8192    # max batch-tile width (lanes); ~4.5 MiB/tile VMEM footprint in f32


def _round_up(n, m):
    return ((n + m - 1) // m) * m


def _cdiv(a, b):
    return -(-a // b)


def _choose_tiling(batch):
    """Return (b_tile, b_pad): pad to a 128 multiple first, then tile.

    Small/medium batches collapse to a single grid step; larger batches split
    into an even number of balanced 128-multiple tiles (one per v7x TC).
    """
    b_min = _round_up(max(batch, 1), LANES)
    if b_min <= MAX_B_TILE:
        return b_min, b_min
    n_tiles = _cdiv(b_min, MAX_B_TILE)
    if n_tiles % 2:
        n_tiles += 1            # even tile count -> balanced across v7x's 2 TensorCores
    b_tile = _round_up(_cdiv(b_min, n_tiles), LANES)
    return b_tile, n_tiles * b_tile


def _policy_kernel(xt_ref, w1t_ref, w2_ref, o_ref, *, action_bound):
    # fc1 (+ folded b1) on the MXU: (H_PAD, S_PAD) @ (S_PAD, B_TILE) -> (H_PAD, B_TILE)
    h = jnp.dot(w1t_ref[...], xt_ref[...], preferred_element_type=jnp.float32)
    h = jnp.maximum(h, 0.0)                                   # VPU
    # fc2 (+ folded b2) as a VPU multiply + sublane (XLU) reduction instead of
    # an M=1 MXU matmul: (H_PAD, B_TILE) * (H_PAD, 1) -> sum over hidden -> (1, B_TILE).
    y = jnp.sum(h * w2_ref[...], axis=0, keepdims=True)
    # tanh runs on the EUP; output store is lane-dense (batch on the lane axis).
    o_ref[...] = (jnp.tanh(y) * action_bound).astype(o_ref.dtype)


def pack_policy_params(w1, b1, w2, b2):
    """One-time pack of (w1, b1, w2, b2) into padded, transposed, bias-folded arrays.

    Call this ONCE at init (not per forward); pass the result to
    policy_net_forward_packed.
    """
    w1 = jnp.asarray(w1, jnp.float32)                        # (S, H)
    w2 = jnp.asarray(w2, jnp.float32)                        # (H, 1)
    b1 = jnp.reshape(jnp.asarray(b1, jnp.float32), (-1,))    # (H,)
    b2 = jnp.reshape(jnp.asarray(b2, jnp.float32), (-1,))    # (1,)
    s, h = w1.shape
    assert w2.shape == (h, ACTION_DIM) and ACTION_DIM == 1
    # Needs one spare column/row for the folded biases.
    assert s < S_PAD and h < H_PAD
    # W1^T with b1 folded into column `s` (multiplied by the ones row of x);
    # hidden row `h` is a constant-one unit (relu(1*1) == 1) that carries b2.
    w1t = jnp.zeros((H_PAD, S_PAD), jnp.float32)
    w1t = w1t.at[:h, :s].set(w1.T)
    w1t = w1t.at[:h, s].set(b1)
    w1t = w1t.at[h, s].set(1.0)
    # fc2 weight column with b2 folded into the constant-one hidden row.
    w2a = jnp.zeros((H_PAD, 1), jnp.float32)
    w2a = w2a.at[:h, 0].set(w2[:, 0])
    w2a = w2a.at[h, 0].set(b2[0])
    return w1t, w2a


def _pack_x(x, b_pad):
    """Transpose + pad x to (S_PAD, b_pad) with a ones row for the folded biases."""
    b, s = x.shape
    xt = jnp.zeros((S_PAD, b_pad), jnp.float32)
    xt = xt.at[:s, :b].set(jnp.asarray(x, jnp.float32).T)
    xt = xt.at[s, :b].set(1.0)   # padded batch columns stay all-zero -> tanh(0)*bound = 0 there
    return xt


@functools.partial(jax.jit, static_argnames=("action_bound",))
def policy_net_forward_packed(x, w1t, w2a, action_bound=ACTION_BOUND):
    """x: (B, state_dim) f32, pre-packed weights -> (B, action_dim) f32."""
    batch = x.shape[0]
    b_tile, b_pad = _choose_tiling(batch)

    xt = _pack_x(x, b_pad)                                   # (S_PAD, b_pad), fused under jit
    kernel = functools.partial(_policy_kernel, action_bound=float(action_bound))
    yt = pl.pallas_call(
        kernel,
        out_shape=jax.ShapeDtypeStruct((1, b_pad), jnp.float32),
        grid=(b_pad // b_tile,),
        in_specs=[
            # x tile: batch on the lane axis, double-buffered across the grid.
            pl.BlockSpec((S_PAD, b_tile), lambda i: (0, i)),
            # Weights: constant index_map -> stay resident in VMEM.
            pl.BlockSpec((H_PAD, S_PAD), lambda i: (0, 0)),
            pl.BlockSpec((H_PAD, 1), lambda i: (0, 0)),
        ],
        # Lane-dense output row per batch tile.
        out_specs=pl.BlockSpec((1, b_tile), lambda i: (0, i)),
        compiler_params=pltpu.CompilerParams(
            dimension_semantics=("parallel",)),
    )(xt, w1t, w2a)

    # Back to the PyTorch layout (B, ACTION_DIM); drop batch padding.
    return yt[0, :batch].reshape(batch, ACTION_DIM)


def policy_net_forward(x, w1, b1, w2, b2, action_bound=ACTION_BOUND):
    """Convenience wrapper matching the original signature (packs weights per call).

    Prefer pack_policy_params(...) once + policy_net_forward_packed(...) per step.
    """
    w1t, w2a = pack_policy_params(w1, b1, w2, b2)
    return policy_net_forward_packed(x, w1t, w2a, action_bound=float(action_bound))


def init_params(key):
    """Deterministic init mimicking PyTorch Linear default: U(-1/sqrt(fan_in), 1/sqrt(fan_in))."""
    k1, k2, k3, k4 = jax.random.split(key, 4)
    bnd1 = 1.0 / (STATE_DIM ** 0.5)
    bnd2 = 1.0 / (HIDDEN_DIM ** 0.5)
    # stored as (in, out) — i.e. transposed relative to PyTorch's (out, in)
    w1 = jax.random.uniform(k1, (STATE_DIM, HIDDEN_DIM), jnp.float32, -bnd1, bnd1)
    b1 = jax.random.uniform(k2, (1, HIDDEN_DIM), jnp.float32, -bnd1, bnd1)
    w2 = jax.random.uniform(k3, (HIDDEN_DIM, ACTION_DIM), jnp.float32, -bnd2, bnd2)
    b2 = jax.random.uniform(k4, (1, ACTION_DIM), jnp.float32, -bnd2, bnd2)
    return w1, b1, w2, b2


def reference_forward(x, w1, b1, w2, b2, action_bound=ACTION_BOUND):
    h = jnp.maximum(x @ w1 + b1, 0.0)
    return jnp.tanh(h @ w2 + b2) * action_bound


if __name__ == "__main__":
    key = jax.random.PRNGKey(0)
    kx, kp, kx2, kx3 = jax.random.split(key, 4)
    w1, b1, w2, b2 = init_params(kp)

    # One-time weight packing (hoisted out of the per-call path).
    w1t, w2a = pack_policy_params(w1, b1, w2, b2)

    # Small "acting" batch: pads to a single 128-wide tile, grid = 1.
    batch = 8
    x = jax.random.normal(kx, (batch, STATE_DIM), jnp.float32)
    out = jax.block_until_ready(
        policy_net_forward_packed(x, w1t, w2a, action_bound=ACTION_BOUND))
    ref = reference_forward(x, w1, b1, w2, b2)
    assert out.shape == (batch, ACTION_DIM)
    assert jnp.allclose(out, ref, atol=1e-5, rtol=1e-5), "mismatch vs reference (small batch)"

    # Replay-style batch: pads 1030 -> 1152 columns (not 1536), still grid = 1.
    batch2 = 1030
    x2 = jax.random.normal(kx2, (batch2, STATE_DIM), jnp.float32)
    out2 = jax.block_until_ready(
        policy_net_forward_packed(x2, w1t, w2a, action_bound=ACTION_BOUND))
    ref2 = reference_forward(x2, w1, b1, w2, b2)
    assert out2.shape == (batch2, ACTION_DIM)
    assert jnp.allclose(out2, ref2, atol=1e-5, rtol=1e-5), "mismatch vs reference (replay batch)"

    # Large batch: exercises the balanced multi-tile grid (2 tiles x 4608 columns).
    batch3 = 9000
    x3 = jax.random.normal(kx3, (batch3, STATE_DIM), jnp.float32)
    out3 = jax.block_until_ready(
        policy_net_forward_packed(x3, w1t, w2a, action_bound=ACTION_BOUND))
    ref3 = reference_forward(x3, w1, b1, w2, b2)
    assert out3.shape == (batch3, ACTION_DIM)
    assert jnp.allclose(out3, ref3, atol=1e-5, rtol=1e-5), "mismatch vs reference (large batch)"

    # Convenience (unpacked) wrapper still matches.
    out4 = jax.block_until_ready(policy_net_forward(x, w1, b1, w2, b2))
    assert jnp.allclose(out4, ref, atol=1e-5, rtol=1e-5), "mismatch vs reference (unpacked path)"

    print("KERNEL_OK")
</pallas_src>

<mosaic_0001>
module attributes {stable_mosaic.version = 11 : i64} {
  func.func @_policy_kernel(%arg0: i32, %arg1: memref<8x128xf32, #tpu.memory_space<vmem>>, %arg2: memref<128x8xf32, #tpu.memory_space<vmem>>, %arg3: memref<128x1xf32, #tpu.memory_space<vmem>>, %arg4: memref<1x128xf32, #tpu.memory_space<vmem>>) attributes {dimension_semantics = [#tpu.dimension_semantics<parallel>], iteration_bounds = array<i64: 1>, scalar_prefetch = 0 : i64, scratch_operands = 0 : i64, tpu.core_type = #tpu.core_type<tc>, window_params = [{transform_indices = @transform_0, window_bounds = array<i64: 8, 128>}, {pipeline_mode = #tpu.pipeline_mode<synchronous>, transform_indices = @transform_1, window_bounds = array<i64: 128, 8>}, {pipeline_mode = #tpu.pipeline_mode<synchronous>, transform_indices = @transform_2, window_bounds = array<i64: 128, 1>}, {transform_indices = @transform_3, window_bounds = array<i64: 1, 128>}]} {
    %c0 = arith.constant 0 : index
    %c0_0 = arith.constant 0 : index
    %0 = vector.load %arg2[%c0, %c0_0] : memref<128x8xf32, #tpu.memory_space<vmem>>, vector<128x8xf32>
    %c0_1 = arith.constant 0 : index
    %c0_2 = arith.constant 0 : index
    %1 = vector.load %arg1[%c0_1, %c0_2] : memref<8x128xf32, #tpu.memory_space<vmem>>, vector<8x128xf32>
    %cst = arith.constant dense<0.000000e+00> : vector<128x128xf32>
    %2 = tpu.matmul %0, %1, %cst {dimension_numbers = #tpu.dot_dimension_numbers<[1], [0], [0], [1], [0, 0, 1, 1], [], []>} : vector<128x8xf32>, vector<8x128xf32>, vector<128x128xf32> -> vector<128x128xf32>
    %cst_3 = arith.constant 0.000000e+00 : f32
    %3 = vector.broadcast %cst_3 : f32 to vector<128x128xf32>
    %4 = arith.maximumf %2, %3 : vector<128x128xf32>
    %c0_4 = arith.constant 0 : index
    %c0_5 = arith.constant 0 : index
    %5 = vector.load %arg3[%c0_4, %c0_5] : memref<128x1xf32, #tpu.memory_space<vmem>>, vector<128x1xf32>
    %6 = vector.broadcast %5 : vector<128x1xf32> to vector<128x128xf32>
    %7 = arith.mulf %4, %6 : vector<128x128xf32>
    %cst_6 = arith.constant dense<0.000000e+00> : vector<128xf32>
    %8 = vector.multi_reduction <add>, %7, %cst_6 [0] : vector<128x128xf32> to vector<128xf32>
    %9 = vector.shape_cast %8 : vector<128xf32> to vector<1x128xf32>
    %10 = math.tanh %9 : vector<1x128xf32>
    %cst_7 = arith.constant 2.000000e+00 : f32
    %11 = vector.broadcast %cst_7 : f32 to vector<1x128xf32>
    %12 = arith.mulf %10, %11 : vector<1x128xf32>
    %c0_8 = arith.constant 0 : index
    %c0_9 = arith.constant 0 : index
    %13 = vector.load %arg4[%c0_8, %c0_9] : memref<1x128xf32, #tpu.memory_space<vmem>>, vector<1x128xf32>
    tpu.vector_store %arg4[%c0_8, %c0_9], %12 {strides = array<i32>} : memref<1x128xf32, #tpu.memory_space<vmem>>, vector<1x128xf32>,
    return
  }
  func.func @transform_0(%arg0: i32) -> (i32, i32) {
    %c0_i32 = arith.constant 0 : i32
    %c0_i32_0 = arith.constant 0 : i32
    return %c0_i32, %arg0 : i32, i32
  }
  func.func @transform_1(%arg0: i32) -> (i32, i32) {
    %c0_i32 = arith.constant 0 : i32
    %c0_i32_0 = arith.constant 0 : i32
    %c0_i32_1 = arith.constant 0 : i32
    return %c0_i32, %c0_i32_0 : i32, i32
  }
  func.func @transform_2(%arg0: i32) -> (i32, i32) {
    %c0_i32 = arith.constant 0 : i32
    %c0_i32_0 = arith.constant 0 : i32
    %c0_i32_1 = arith.constant 0 : i32
    return %c0_i32, %c0_i32_0 : i32, i32
  }
  func.func @transform_3(%arg0: i32) -> (i32, i32) {
    %c0_i32 = arith.constant 0 : i32
    %c0_i32_0 = arith.constant 0 : i32
    return %c0_i32, %arg0 : i32, i32
  }
}

</mosaic_0001>

<bundles_post_ra>
// kernel: policy_net_forward_packed.1
= control target key start
LH: loop header
LB: loop body
LE: loop exit
PB: predicated region body
PF: predicated region fallthrough
CT: control target
= control target key end

     0   :  { %vm31_vm0 = vcmask 64512   ;;  %v447_v3 = vmov 0   ;;  %s586_s0 = inlined_call_operand.vmem [shape: f32[8,128], index: 0, kind: input, shape index: {}]   ;;  %s587_s1 = inlined_call_operand.vmem [shape: f32[128,8], index: 1, kind: input, shape index: {}]   ;;  %s588_s2 = inlined_call_operand.vmem [shape: f32[128,1], index: 2, kind: input, shape index: {}]   ;;  %s589_s3 = inlined_call_operand.vmem [shape: f32[1,128], index: 3, kind: output, shape index: {}]  }
   0x1   :  { %v30_v0 = vld [vmem:[%s586_s0] sm:$0xff]  ;;  %443 = vset.pattern.permute.xlu0 %v447_v3  ;;  %444 = vset.pattern.permute.xlu1 %v447_v3  ;;  %v15_v4 = vld [vmem:[%s587_s1 + $0x8] sm:$0xff]  ;;  %v16_v6 = vld [vmem:[%s587_s1 + $0x10] sm:$0xff] }
   0x2   :  { %v14_v1 = vld [vmem:[%s587_s1] sm:$0xff]  ;;  %414 = vmatprep.subr.mxu0 %v30_v0  ;;  %440 = vmatprep.subr.mxu1 %v30_v0  ;;  %v23_v5 = vld [vmem:[%s587_s1 + $0x48] sm:$0xff]  ;;  %v24_v7 = vld [vmem:[%s587_s1 + $0x50] sm:$0xff] }
   0x3   :  { %v22_v2 = vld [vmem:[%s587_s1 + $0x40] sm:$0xff]  ;;  %415 = vmatpush3.msra.mxu0 %v30_v0  ;;  %441 = vmatpush3.msra.mxu1 %v30_v0  ;;  %v17_v8 = vld [vmem:[%s587_s1 + $0x18] sm:$0xff]  ;;  %v243_v13 = vld [vmem:[%s588_s2 + $0x10] sm:$0xff] }
   0x4   :  { %416 = vmatprep.mubr.msk.f32.mxu0 %vm31_vm0, %v14_v1  ;;  %428 = vmatprep.mubr.msk.f32.mxu1 %vm31_vm0, %v22_v2  ;;  %v25_v9 = vld [vmem:[%s587_s1 + $0x58] sm:$0xff]  ;;  %v241_v10 = vld [vmem:[%s588_s2] sm:$0xff]  ;;  %v242_v14 = vld [vmem:[%s588_s2 + $0x8] sm:$0xff] }
   0x5   :  { %417 = vmatmul.mubr.msk.f32.vlgmr.msra.gmra.mrb[0].mxu0 %vm31_vm0, %v15_v4  ;;  %429 = vmatmul.mubr.msk.f32.vlgmr.msra.gmra.mrb[0].mxu1 %vm31_vm0, %v23_v5  ;;  %v18_v11 = vld [vmem:[%s587_s1 + $0x20] sm:$0xff]  ;;  %v244_v15 = vld [vmem:[%s588_s2 + $0x18] sm:$0xff]  ;;  %v19_v16 = vld [vmem:[%s587_s1 + $0x28] sm:$0xff] }
   0x6   :  { %419 = vmatprep.mubr.msk.f32.mxu0 %vm31_vm0, %v16_v6  ;;  %431 = vmatprep.mubr.msk.f32.mxu1 %vm31_vm0, %v24_v7  ;;  %v26_v12 = vld [vmem:[%s587_s1 + $0x60] sm:$0xff]  ;;  %v27_v17 = vld [vmem:[%s587_s1 + $0x68] sm:$0xff]  ;;  %v20_v18 = vld [vmem:[%s587_s1 + $0x30] sm:$0xff] }
   0x7   :  { %259 = vperm.xlu0 %443, %v241_v10   ;;  %269 = vperm.xlu1 %444, %v243_v13   ;;  %v28_v19 = vld [vmem:[%s587_s1 + $0x70] sm:$0xff]  ;;  %v245_v20 = vld [vmem:[%s588_s2 + $0x20] sm:$0xff]  ;;  %v246_v21 = vld [vmem:[%s588_s2 + $0x28] sm:$0xff] }
   0x8   :  { %v21_v22 = vld [vmem:[%s587_s1 + $0x38] sm:$0xff]  ;;  %v247_v24 = vld [vmem:[%s588_s2 + $0x30] sm:$0xff]  ;;  %v249_v26 = vld [vmem:[%s588_s2 + $0x40] sm:$0xff] }
   0x9   :  { %420 = vmatmul.mubr.msk.f32.gmra.mrb[2].mxu0 %vm31_vm0, %v17_v8  ;;  %432 = vmatmul.mubr.msk.f32.gmra.mrb[2].mxu1 %vm31_vm0, %v25_v9  ;;  %v29_v23 = vld [vmem:[%s587_s1 + $0x78] sm:$0xff]  ;;  %v250_v27 = vld [vmem:[%s588_s2 + $0x48] sm:$0xff]  ;;  %v251_v28 = vld [vmem:[%s588_s2 + $0x50] sm:$0xff] }
   0xa   :  { %422 = vmatprep.mubr.msk.f32.mxu0 %vm31_vm0, %v18_v11  ;;  %434 = vmatprep.mubr.msk.f32.mxu1 %vm31_vm0, %v26_v12  ;;  %v248_v25 = vld [vmem:[%s588_s2 + $0x38] sm:$0xff]  ;;  %v253_v30 = vld [vmem:[%s588_s2 + $0x60] sm:$0xff]  ;;  %v254_v31 = vld [vmem:[%s588_s2 + $0x68] sm:$0xff] }
   0xb   :  { %264 = vperm.xlu0 %443, %v242_v14   ;;  %274 = vperm.xlu1 %444, %v244_v15   ;;  %v252_v29 = vld [vmem:[%s588_s2 + $0x58] sm:$0xff]  ;;  %v255_v32 = vld [vmem:[%s588_s2 + $0x70] sm:$0xff] }
   0xc   :  { %v256_v33 = vld [vmem:[%s588_s2 + $0x78] sm:$0xff] }
   0xd   :  { %423 = vmatmul.mubr.msk.f32.gmra.mrb[4].mxu0 %vm31_vm0, %v19_v16  ;;  %435 = vmatmul.mubr.msk.f32.gmra.mrb[4].mxu1 %vm31_vm0, %v27_v17 }
   0xe   :  { %425 = vmatprep.mubr.msk.f32.mxu0 %vm31_vm0, %v20_v18  ;;  %437 = vmatprep.mubr.msk.f32.mxu1 %vm31_vm0, %v28_v19 }
   0xf   :  { %279 = vperm.xlu0 %443, %v245_v20   ;;  %284 = vperm.xlu1 %444, %v246_v21  }
  0x11   :  { %426 = vmatmul.mubr.msk.f32.gmra.mrb[6].mxu0 %vm31_vm0, %v21_v22  ;;  %438 = vmatmul.mubr.msk.f32.gmra.mrb[6].mxu1 %vm31_vm0, %v29_v23 }
  0x13   :  { %289 = vperm.xlu0 %443, %v247_v24   ;;  %294 = vperm.xlu1 %444, %v248_v25  }
  0x17   :  { %299 = vperm.xlu0 %443, %v249_v26   ;;  %304 = vperm.xlu1 %444, %v250_v27  }
  0x1b   :  { %309 = vperm.xlu0 %443, %v251_v28   ;;  %314 = vperm.xlu1 %444, %v252_v29  }
  0x1f   :  { %319 = vperm.xlu0 %443, %v253_v30   ;;  %324 = vperm.xlu1 %444, %v254_v31  }
  0x23   :  { %329 = vperm.xlu0 %443, %v255_v32   ;;  %334 = vperm.xlu1 %444, %v256_v33  }
  0x86   :  { %v260_v34 = vpop.permute.xlu0 %259  ;;  %v270_v35 = vpop.permute.xlu1 %269 }
  0x8a   :  { %v265_v36 = vpop.permute.xlu0 %264  ;;  %v275_v37 = vpop.permute.xlu1 %274 }
  0x8e   :  { %v280_v38 = vpop.permute.xlu0 %279  ;;  %v285_v39 = vpop.permute.xlu1 %284 }
  0x92   :  { %v290_v46 = vpop.permute.xlu0 %289  ;;  %v295_v56 = vpop.permute.xlu1 %294 }
  0x96   :  { %v300_v2 = vpop.permute.xlu0 %299  ;;  %v305_v13 = vpop.permute.xlu1 %304 }
  0x9a   :  { %v310_v20 = vpop.permute.xlu0 %309  ;;  %v315_v24 = vpop.permute.xlu1 %314 }
  0x9e   :  { %v320_v31 = vpop.permute.xlu0 %319 }
  0xd8   :  { %v418_v40 = vpop.f32.mrb[0].mxu0  ;;  %v430_v41 = vpop.f32.mrb[0].mxu1 }
  0xd9   :  { %v226_v42 = vmax.f32 %v418_v40, 0.0  ;;  %v146_v43 = vpop.f32.mrb[1].mxu0  ;;  %v186_v44 = vpop.f32.mrb[1].mxu1  ;;  %v234_v17 = vmax.f32 %v430_v41, 0.0 }
  0xda   :  { %v225_v45 = vmax.f32 %v146_v43, 0.0  ;;  %v233_v14 = vmax.f32 %v186_v44, 0.0 }
  0xdb   :  { %v338_v47 = vmul.f32 %v265_v36, %v226_v42  ;;  %v346_v25 = vmul.f32 %v305_v13, %v234_v17  ;;  %v330_v42 = vpop.permute.xlu0 %329 }
  0xdc   :  { %v337_v48 = vmul.f32 %v260_v34, %v225_v45  ;;  %v421_v49 = vpop.f32.mrb[2].mxu0  ;;  %v433_v50 = vpop.f32.mrb[2].mxu1  ;;  %v345_v21 = vmul.f32 %v300_v2, %v233_v14 }
  0xdd   :  { %v156_v51 = vpop.f32.mrb[3].mxu0  ;;  %v196_v52 = vpop.f32.mrb[3].mxu1  ;;  %v228_v54 = vmax.f32 %v421_v49, 0.0  ;;  %v236_v26 = vmax.f32 %v433_v50, 0.0 }
  0xde   :  { %v353_v53 = vadd.f32 %v338_v47, %v337_v48  ;;  %v227_v55 = vmax.f32 %v156_v51, 0.0  ;;  %v235_v22 = vmax.f32 %v196_v52, 0.0 }
  0xdf   :  { %v340_v62 = vmul.f32 %v275_v37, %v228_v54  ;;  %v348_v32 = vmul.f32 %v315_v24, %v236_v26 }
  0xe0   :  { %v339_v57 = vmul.f32 %v270_v35, %v227_v55  ;;  %v424_v58 = vpop.f32.mrb[4].mxu0  ;;  %v436_v59 = vpop.f32.mrb[4].mxu1  ;;  %v347_v28 = vmul.f32 %v310_v20, %v235_v22 }
  0xe1   :  { %v166_v60 = vpop.f32.mrb[5].mxu0  ;;  %v206_v61 = vpop.f32.mrb[5].mxu1  ;;  %v230_v0 = vmax.f32 %v424_v58, 0.0  ;;  %v238_v33 = vmax.f32 %v436_v59, 0.0 }
  0xe2   :  { %v354_v63 = vadd.f32 %v353_v53, %v339_v57  ;;  %v229_v1 = vmax.f32 %v166_v60, 0.0  ;;  %v237_v29 = vmax.f32 %v206_v61, 0.0  ;;  %v325_v35 = vpop.permute.xlu1 %324 }
  0xe3   :  { %v342_v9 = vmul.f32 %v285_v39, %v230_v0  ;;  %v350_v39 = vmul.f32 %v325_v35, %v238_v33 }
  0xe4   :  { %v341_v3 = vmul.f32 %v280_v38, %v229_v1  ;;  %v355_v4 = vadd.f32 %v354_v63, %v340_v62  ;;  %v427_v5 = vpop.f32.mrb[6].mxu0  ;;  %v439_v6 = vpop.f32.mrb[6].mxu1  ;;  %v349_v36 = vmul.f32 %v320_v31, %v237_v29 }
  0xe5   :  { %v176_v7 = vpop.f32.mrb[7].mxu0  ;;  %v216_v8 = vpop.f32.mrb[7].mxu1  ;;  %v232_v11 = vmax.f32 %v427_v5, 0.0  ;;  %v240_v40 = vmax.f32 %v439_v6, 0.0 }
  0xe6   :  { %v356_v10 = vadd.f32 %v355_v4, %v341_v3  ;;  %v231_v12 = vmax.f32 %v176_v7, 0.0  ;;  %v239_v37 = vmax.f32 %v216_v8, 0.0  ;;  %v335_v45 = vpop.permute.xlu1 %334 }
  0xe7   :  { %v344_v18 = vmul.f32 %v295_v56, %v232_v11 }
  0xe8   :  { %v343_v15 = vmul.f32 %v290_v46, %v231_v12  ;;  %v357_v16 = vadd.f32 %v356_v10, %v342_v9  ;;  %v351_v43 = vmul.f32 %v330_v42, %v239_v37  ;;  %v352_v46 = vmul.f32 %v335_v45, %v240_v40 }
  0xea   :  { %v358_v19 = vadd.f32 %v357_v16, %v343_v15 }
  0xec   :  { %v359_v23 = vadd.f32 %v358_v19, %v344_v18 }
  0xee   :  { %v360_v27 = vadd.f32 %v359_v23, %v345_v21 }
  0xf0   :  { %v361_v30 = vadd.f32 %v360_v27, %v346_v25 }
  0xf2   :  { %v362_v34 = vadd.f32 %v361_v30, %v347_v28 }
  0xf4   :  { %v363_v38 = vadd.f32 %v362_v34, %v348_v32 }
  0xf6   :  { %v364_v41 = vadd.f32 %v363_v38, %v349_v36 }
  0xf8   :  { %v365_v44 = vadd.f32 %v364_v41, %v350_v39 }
  0xfa   :  { %v366_v47 = vadd.f32 %v365_v44, %v351_v43 }
  0xfc   :  { %v367_v48 = vadd.f32 %v366_v47, %v352_v46 }
  0xfe   :  { %v368_v49 = vrot.slane %v367_v48, 4 }
 0x100   :  { %v369_v50 = vadd.f32 %v368_v49, %v367_v48 }
 0x102   :  { %v370_v51 = vrot.slane %v369_v50, 2 }
 0x104   :  { %v371_v52 = vadd.f32 %v370_v51, %v369_v50 }
 0x106   :  { %v372_v53 = vrot.slane %v371_v52, 1 }
 0x108   :  { %v373_v54 = vadd.f32 %v372_v53, %v371_v52 }
 0x10a   :  { %445 = vtanh.f32 %v373_v54 }
 0x114   :  { %v446_v55 = vpop.eup %445 }
 0x115   :  { %v375_v56 = vmul.f32 2.0, %v446_v55 }
 0x117   :  { %376 = vst [vmem:[%s589_s3] sm:$0x1] %v375_v56 }

</bundles_post_ra>
